<compile_context>
chip_gen: v7x
topology: tpu7x:2x2x1
jax: 0.10.0
libtpu: 0.0.40
codegen_flags: <defaults>
</compile_context>

<pallas_src>
import jax
import jax.numpy as jnp
from jax.experimental import pallas as pl
from jax.experimental.pallas import tpu as pltpu

_LANE = 128
_TILE_H = 512          # hidden-chunk width (K tiling for the 2nd matmul)


def _round_up(n, m):
    return ((n + m - 1) // m) * m


def _mlp_kernel(x_ref, w1_ref, b1_ref, w2_ref, b2_ref, o_ref, acc_ref):
    """One (batch-tile, hidden-chunk) step of relu(x@W1+b1)@W2 + b2.

    Grid axis 0 = batch tiles ("parallel"), axis 1 = hidden chunks
    ("arbitrary", reduced into acc_ref).
    """
    k = pl.program_id(1)

    @pl.when(k == 0)
    def _():
        acc_ref[...] = jnp.zeros_like(acc_ref)

    # f32 -> bf16 cast of activations fused into the kernel (no wrapper pass).
    x = x_ref[...].astype(jnp.bfloat16)
    h = jnp.dot(x, w1_ref[...], preferred_element_type=jnp.float32)
    h = jnp.maximum(h + b1_ref[...], 0.0)                    # bias + ReLU in f32
    acc_ref[...] += jnp.dot(h.astype(jnp.bfloat16), w2_ref[...],
                            preferred_element_type=jnp.float32)

    @pl.when(k == pl.num_programs(1) - 1)
    def _():
        o_ref[...] = (acc_ref[...] + b2_ref[...]).astype(o_ref.dtype)


def prepare_params(w1, b1, w2, b2):
    """One-time parameter prep: pad to lane multiples, cast weights to bf16.

    Done at parameter-setup time so the per-call forward does zero pad/cast
    passes over the weights (the review's main HBM-traffic complaint).
    """
    in_f, hidden = w1.shape
    out_f = w2.shape[1]
    # Pad hidden so that the chosen hidden chunk (min(hid_p, _TILE_H)) divides it.
    hid_pad_to = _TILE_H if hidden > _TILE_H else _LANE
    hid_p = _round_up(hidden, hid_pad_to)
    out_p = _round_up(out_f, _LANE)
    # Zero padding is exact: padded hidden cols give relu(0)=0 and padded W2
    # rows/cols are zero; padded output cols are sliced off in the wrapper.
    w1p = jnp.pad(w1.astype(jnp.bfloat16), ((0, 0), (0, hid_p - hidden)))
    b1p = jnp.pad(b1.reshape(1, -1).astype(jnp.float32),
                  ((0, 0), (0, hid_p - hidden)))
    w2p = jnp.pad(w2.astype(jnp.bfloat16),
                  ((0, hid_p - hidden), (0, out_p - out_f)))
    b2p = jnp.pad(b2.reshape(1, -1).astype(jnp.float32),
                  ((0, 0), (0, out_p - out_f)))
    return {"w1": w1p, "b1": b1p, "w2": w2p, "b2": b2p,
            "in_f": in_f, "hidden": hidden, "out_f": out_f,
            "hid_p": hid_p, "out_p": out_p}


def _build_mlp_call(batch_p, in_f, hid_p, out_p, tb, tile_h, out_dtype,
                    single_buffer_resident, vmem_limit_bytes, cost):
    n_b = batch_p // tb
    n_h = hid_p // tile_h

    def spec(shape, index_map, constant):
        if constant and single_buffer_resident:
            # Constant index map -> no prefetch overlap needed; halve the
            # VMEM footprint of resident weights/biases.
            return pl.BlockSpec(shape, index_map, pipeline_mode=pl.Buffered(1))
        return pl.BlockSpec(shape, index_map)

    w_const = (n_h == 1)   # weight/b1 blocks constant across the whole grid?
    in_specs = [
        pl.BlockSpec((tb, in_f), lambda i, k: (i, 0)),        # x (f32, full in_f)
        spec((in_f, tile_h), lambda i, k: (0, k), w_const),   # W1 chunk (bf16)
        spec((1, tile_h), lambda i, k: (0, k), w_const),      # b1 chunk (f32)
        spec((tile_h, out_p), lambda i, k: (k, 0), w_const),  # W2 chunk (bf16)
        spec((1, out_p), lambda i, k: (0, 0), True),          # b2 (f32, constant)
    ]
    return pl.pallas_call(
        _mlp_kernel,
        out_shape=jax.ShapeDtypeStruct((batch_p, out_p), out_dtype),
        grid_spec=pltpu.PrefetchScalarGridSpec(
            num_scalar_prefetch=0,
            grid=(n_b, n_h),
            in_specs=in_specs,
            out_specs=pl.BlockSpec((tb, out_p), lambda i, k: (i, 0)),
            scratch_shapes=[pltpu.VMEM((tb, out_p), jnp.float32)],
        ),
        compiler_params=pltpu.CompilerParams(
            dimension_semantics=("parallel", "arbitrary"),
            vmem_limit_bytes=vmem_limit_bytes),
        cost_estimate=cost,
    )


def abc_model_forward(x, params, *, tile_b_cap=256, vmem_budget_bytes=40 << 20):
    """Equivalent of ABCModel.forward(x) == self.model(x) for the concrete MLP."""
    batch, in_f = x.shape
    assert in_f == params["in_f"], "feature-dim mismatch between x and params"
    hid_p, out_p, out_f = params["hid_p"], params["out_p"], params["out_f"]
    tile_h = min(hid_p, _TILE_H)   # divides hid_p by construction (prepare_params)

    # Batch tile: multiple of 16 (bf16 sublane packing) when possible, capped
    # at 256 (fills the 256-wide MXU on v6e/v7x), and >= 2 grid steps when the
    # batch is big enough so "parallel" can shard across v7x's 2 TensorCores.
    if batch <= 16:
        tb = _round_up(batch, 8)
    else:
        tb = min(tile_b_cap, _round_up(pl.cdiv(batch, 2), 16))

    # VMEM sizing, re-derived against the v7x 64 MiB budget (with headroom).
    def vmem_estimate(tb_):
        w_buf = 1 if hid_p == tile_h else 2        # resident weights single-buffered
        return (2 * tb_ * in_f * 4                                   # x (dbl-buffered)
                + w_buf * (in_f * tile_h * 2 + tile_h * out_p * 2 + tile_h * 4)
                + out_p * 4                                          # b2
                + tb_ * tile_h * 4                                   # f32 h temp
                + tb_ * out_p * 4                                    # accumulator
                + 2 * tb_ * out_p * 4)                               # out (dbl-buffered)

    while vmem_estimate(tb) > vmem_budget_bytes and tb > 8:
        tb = max(8, _round_up(tb // 2, 8))
    vmem_limit = min(48 << 20, max(32 << 20, (vmem_estimate(tb) * 3) // 2))

    b_p = _round_up(batch, tb)
    xp = x if b_p == batch else jnp.pad(x, ((0, b_p - batch), (0, 0)))

    cost = pl.CostEstimate(
        flops=2 * b_p * (in_f * hid_p + hid_p * out_p),
        transcendentals=0,
        bytes_accessed=(b_p * in_f * 4 + in_f * hid_p * 2 + hid_p * out_p * 2
                        + hid_p * 4 + out_p * 4 + b_p * out_p * 4))

    args = (xp, params["w1"], params["b1"], params["w2"], params["b2"])
    try:
        yp = _build_mlp_call(b_p, in_f, hid_p, out_p, tb, tile_h, x.dtype,
                             True, vmem_limit, cost)(*args)
    except Exception:
        # Fallback if this JAX build rejects pl.Buffered(1) on pallas_call specs.
        yp = _build_mlp_call(b_p, in_f, hid_p, out_p, tb, tile_h, x.dtype,
                             False, vmem_limit, cost)(*args)

    # TODO(synk): for very large out_f, add an output-column grid axis too.
    return yp[:batch, :out_f]


def _reference_forward(x, w1, b1, w2, b2):
    # Matches kernel arithmetic: bf16 operands, f32 accumulation, f32 bias/ReLU.
    h = jnp.dot(x.astype(jnp.bfloat16), w1.astype(jnp.bfloat16),
                preferred_element_type=jnp.float32) + b1
    h = jnp.maximum(h, 0.0)
    y = jnp.dot(h.astype(jnp.bfloat16), w2.astype(jnp.bfloat16),
                preferred_element_type=jnp.float32) + b2
    return y.astype(x.dtype)


def _make_params(key, in_f, hidden, out_f):
    k_w1, k_b1, k_w2, k_b2 = jax.random.split(key, 4)
    w1 = jax.random.normal(k_w1, (in_f, hidden), dtype=jnp.float32) * 0.1
    b1 = jax.random.normal(k_b1, (hidden,), dtype=jnp.float32) * 0.01
    w2 = jax.random.normal(k_w2, (hidden, out_f), dtype=jnp.float32) * 0.1
    b2 = jax.random.normal(k_b2, (out_f,), dtype=jnp.float32) * 0.01
    return w1, b1, w2, b2


if __name__ == "__main__":
    key = jax.random.PRNGKey(0)
    k1, k2, kp1, kp2 = jax.random.split(key, 4)

    # Case 1: small, non-lane-aligned shapes (weights padded once in prepare).
    batch, in_f, hidden, out_f = 8, 32, 64, 32
    x = jax.random.normal(k1, (batch, in_f), dtype=jnp.float32)
    w1, b1, w2, b2 = _make_params(kp1, in_f, hidden, out_f)
    params = prepare_params(w1, b1, w2, b2)      # one-time, outside the hot path
    y = abc_model_forward(x, params)
    jax.block_until_ready(y)
    y_ref = _reference_forward(x, w1, b1, w2, b2)
    assert y.shape == (batch, out_f)
    assert jnp.allclose(y, y_ref, atol=1e-3, rtol=1e-3)

    # Case 2: lane-aligned shapes exercising the 2-step batch-parallel grid
    # with zero per-call pad/cast work on the activations.
    batch, in_f, hidden, out_f = 256, 128, 256, 128
    x = jax.random.normal(k2, (batch, in_f), dtype=jnp.float32)
    w1, b1, w2, b2 = _make_params(kp2, in_f, hidden, out_f)
    params = prepare_params(w1, b1, w2, b2)
    y = abc_model_forward(x, params)
    jax.block_until_ready(y)
    y_ref = _reference_forward(x, w1, b1, w2, b2)
    assert y.shape == (batch, out_f)
    assert jnp.allclose(y, y_ref, atol=1e-3, rtol=1e-3)

    # TODO(synk): training_step / validation_step / configure_optimizers are
    # abstract training-loop hooks with no forward-pass compute; not kernels.
    print("KERNEL_OK")
</pallas_src>

<mosaic_0001>
module attributes {stable_mosaic.version = 11 : i64} {
  func.func @_mlp_kernel(%arg0: i32, %arg1: i32, %arg2: memref<8x32xf32, #tpu.memory_space<vmem>>, %arg3: memref<32x128xbf16, #tpu.memory_space<vmem>>, %arg4: memref<1x128xf32, #tpu.memory_space<vmem>>, %arg5: memref<128x128xbf16, #tpu.memory_space<vmem>>, %arg6: memref<1x128xf32, #tpu.memory_space<vmem>>, %arg7: memref<8x128xf32, #tpu.memory_space<vmem>>, %arg8: memref<8x128xf32, #tpu.memory_space<vmem>>) attributes {dimension_semantics = [#tpu.dimension_semantics<parallel>, #tpu.dimension_semantics<arbitrary>], iteration_bounds = array<i64: 1, 1>, scalar_prefetch = 0 : i64, scratch_operands = 1 : i64, tpu.core_type = #tpu.core_type<tc>, window_params = [{transform_indices = @transform_0, window_bounds = array<i64: 8, 32>}, {pipeline_mode = #tpu.pipeline_mode<synchronous>, transform_indices = @transform_1, window_bounds = array<i64: 32, 128>}, {pipeline_mode = #tpu.pipeline_mode<synchronous>, transform_indices = @transform_2, window_bounds = array<i64: 1, 128>}, {pipeline_mode = #tpu.pipeline_mode<synchronous>, transform_indices = @transform_3, window_bounds = array<i64: 128, 128>}, {pipeline_mode = #tpu.pipeline_mode<synchronous>, transform_indices = @transform_4, window_bounds = array<i64: 1, 128>}, {transform_indices = @transform_5, window_bounds = array<i64: 8, 128>}]} {
    %c0_i32 = arith.constant 0 : i32
    %0 = arith.cmpi eq, %arg1, %c0_i32 : i32
    %1 = arith.extui %0 : i1 to i32
    %c0_i32_0 = arith.constant 0 : i32
    %2 = arith.cmpi ne, %1, %c0_i32_0 : i32
    scf.if %2 {
      %cst_16 = arith.constant 0.000000e+00 : f32
      %21 = vector.broadcast %cst_16 : f32 to vector<8x128xf32>
      %c0_17 = arith.constant 0 : index
      %c0_18 = arith.constant 0 : index
      %22 = vector.load %arg8[%c0_17, %c0_18] : memref<8x128xf32, #tpu.memory_space<vmem>>, vector<8x128xf32>
      tpu.vector_store %arg8[%c0_17, %c0_18], %21 {strides = array<i32>} : memref<8x128xf32, #tpu.memory_space<vmem>>, vector<8x128xf32>,
    } else {
    }
    %c0 = arith.constant 0 : index
    %c0_1 = arith.constant 0 : index
    %3 = vector.load %arg2[%c0, %c0_1] : memref<8x32xf32, #tpu.memory_space<vmem>>, vector<8x32xf32>
    %4 = arith.truncf %3 : vector<8x32xf32> to vector<8x32xbf16>
    %c0_2 = arith.constant 0 : index
    %c0_3 = arith.constant 0 : index
    %5 = vector.load %arg3[%c0_2, %c0_3] : memref<32x128xbf16, #tpu.memory_space<vmem>>, vector<32x128xbf16>
    %cst = arith.constant dense<0.000000e+00> : vector<8x128xf32>
    %6 = tpu.matmul %4, %5, %cst {dimension_numbers = #tpu.dot_dimension_numbers<[1], [0], [0], [1], [0, 0, 1, 1], [], []>} : vector<8x32xbf16>, vector<32x128xbf16>, vector<8x128xf32> -> vector<8x128xf32>
    %c0_4 = arith.constant 0 : index
    %c0_5 = arith.constant 0 : index
    %7 = vector.load %arg4[%c0_4, %c0_5] : memref<1x128xf32, #tpu.memory_space<vmem>>, vector<1x128xf32>
    %8 = vector.broadcast %7 : vector<1x128xf32> to vector<8x128xf32>
    %9 = arith.addf %6, %8 : vector<8x128xf32>
    %cst_6 = arith.constant 0.000000e+00 : f32
    %10 = vector.broadcast %cst_6 : f32 to vector<8x128xf32>
    %11 = arith.maximumf %9, %10 : vector<8x128xf32>
    %c0_7 = arith.constant 0 : index
    %c0_8 = arith.constant 0 : index
    %12 = vector.load %arg8[%c0_7, %c0_8] : memref<8x128xf32, #tpu.memory_space<vmem>>, vector<8x128xf32>
    %13 = arith.truncf %11 : vector<8x128xf32> to vector<8x128xbf16>
    %c0_9 = arith.constant 0 : index
    %c0_10 = arith.constant 0 : index
    %14 = vector.load %arg5[%c0_9, %c0_10] : memref<128x128xbf16, #tpu.memory_space<vmem>>, vector<128x128xbf16>
    %cst_11 = arith.constant dense<0.000000e+00> : vector<8x128xf32>
    %15 = tpu.matmul %13, %14, %cst_11 {dimension_numbers = #tpu.dot_dimension_numbers<[1], [0], [0], [1], [0, 0, 1, 1], [], []>} : vector<8x128xbf16>, vector<128x128xbf16>, vector<8x128xf32> -> vector<8x128xf32>
    %16 = arith.addf %12, %15 : vector<8x128xf32>
    %c0_12 = arith.constant 0 : index
    %c0_13 = arith.constant 0 : index
    %17 = vector.load %arg8[%c0_12, %c0_13] : memref<8x128xf32, #tpu.memory_space<vmem>>, vector<8x128xf32>
    tpu.vector_store %arg8[%c0_12, %c0_13], %16 {strides = array<i32>} : memref<8x128xf32, #tpu.memory_space<vmem>>, vector<8x128xf32>,
    %c0_i32_14 = arith.constant 0 : i32
    %18 = arith.cmpi eq, %arg1, %c0_i32_14 : i32
    %19 = arith.extui %18 : i1 to i32
    %c0_i32_15 = arith.constant 0 : i32
    %20 = arith.cmpi ne, %19, %c0_i32_15 : i32
    scf.if %20 {
      %c0_16 = arith.constant 0 : index
      %c0_17 = arith.constant 0 : index
      %21 = vector.load %arg8[%c0_16, %c0_17] : memref<8x128xf32, #tpu.memory_space<vmem>>, vector<8x128xf32>
      %c0_18 = arith.constant 0 : index
      %c0_19 = arith.constant 0 : index
      %22 = vector.load %arg6[%c0_18, %c0_19] : memref<1x128xf32, #tpu.memory_space<vmem>>, vector<1x128xf32>
      %23 = vector.broadcast %22 : vector<1x128xf32> to vector<8x128xf32>
      %24 = arith.addf %21, %23 : vector<8x128xf32>
      %c0_20 = arith.constant 0 : index
      %c0_21 = arith.constant 0 : index
      %25 = vector.load %arg7[%c0_20, %c0_21] : memref<8x128xf32, #tpu.memory_space<vmem>>, vector<8x128xf32>
      tpu.vector_store %arg7[%c0_20, %c0_21], %24 {strides = array<i32>} : memref<8x128xf32, #tpu.memory_space<vmem>>, vector<8x128xf32>,
    } else {
    }
    return
  }
  func.func @transform_0(%arg0: i32, %arg1: i32) -> (i32, i32) {
    %c0_i32 = arith.constant 0 : i32
    %c0_i32_0 = arith.constant 0 : i32
    return %arg0, %c0_i32 : i32, i32
  }
  func.func @transform_1(%arg0: i32, %arg1: i32) -> (i32, i32) {
    %c0_i32 = arith.constant 0 : i32
    %c0_i32_0 = arith.constant 0 : i32
    return %c0_i32, %arg1 : i32, i32
  }
  func.func @transform_2(%arg0: i32, %arg1: i32) -> (i32, i32) {
    %c0_i32 = arith.constant 0 : i32
    %c0_i32_0 = arith.constant 0 : i32
    return %c0_i32, %arg1 : i32, i32
  }
  func.func @transform_3(%arg0: i32, %arg1: i32) -> (i32, i32) {
    %c0_i32 = arith.constant 0 : i32
    %c0_i32_0 = arith.constant 0 : i32
    return %arg1, %c0_i32 : i32, i32
  }
  func.func @transform_4(%arg0: i32, %arg1: i32) -> (i32, i32) {
    %c0_i32 = arith.constant 0 : i32
    %c0_i32_0 = arith.constant 0 : i32
    %c0_i32_1 = arith.constant 0 : i32
    return %c0_i32, %c0_i32_0 : i32, i32
  }
  func.func @transform_5(%arg0: i32, %arg1: i32) -> (i32, i32) {
    %c0_i32 = arith.constant 0 : i32
    %c0_i32_0 = arith.constant 0 : i32
    return %arg0, %c0_i32 : i32, i32
  }
}

module attributes {stable_mosaic.version = 11 : i64} {
  func.func @_mlp_kernel(%arg0: i32, %arg1: i32, %arg2: memref<8x32xf32, #tpu.memory_space<vmem>>, %arg3: memref<32x128xbf16, #tpu.memory_space<vmem>>, %arg4: memref<1x128xf32, #tpu.memory_space<vmem>>, %arg5: memref<128x128xbf16, #tpu.memory_space<vmem>>, %arg6: memref<1x128xf32, #tpu.memory_space<vmem>>, %arg7: memref<8x128xf32, #tpu.memory_space<vmem>>, %arg8: memref<8x128xf32, #tpu.memory_space<vmem>>) attributes {dimension_semantics = [#tpu.dimension_semantics<parallel>, #tpu.dimension_semantics<arbitrary>], iteration_bounds = array<i64: 1, 1>, scalar_prefetch = 0 : i64, scratch_operands = 1 : i64, tpu.core_type = #tpu.core_type<tc>, window_params = [{transform_indices = @transform_0, window_bounds = array<i64: 8, 32>}, {transform_indices = @transform_1, window_bounds = array<i64: 32, 128>}, {transform_indices = @transform_2, window_bounds = array<i64: 1, 128>}, {transform_indices = @transform_3, window_bounds = array<i64: 128, 128>}, {pipeline_mode = #tpu.pipeline_mode<synchronous>, transform_indices = @transform_4, window_bounds = array<i64: 1, 128>}, {transform_indices = @transform_5, window_bounds = array<i64: 8, 128>}]} {
    %c0_i32 = arith.constant 0 : i32
    %0 = arith.cmpi eq, %arg1, %c0_i32 : i32
    %1 = arith.extui %0 : i1 to i32
    %c0_i32_0 = arith.constant 0 : i32
    %2 = arith.cmpi ne, %1, %c0_i32_0 : i32
    scf.if %2 {
      %cst_16 = arith.constant 0.000000e+00 : f32
      %21 = vector.broadcast %cst_16 : f32 to vector<8x128xf32>
      %c0_17 = arith.constant 0 : index
      %c0_18 = arith.constant 0 : index
      %22 = vector.load %arg8[%c0_17, %c0_18] : memref<8x128xf32, #tpu.memory_space<vmem>>, vector<8x128xf32>
      tpu.vector_store %arg8[%c0_17, %c0_18], %21 {strides = array<i32>} : memref<8x128xf32, #tpu.memory_space<vmem>>, vector<8x128xf32>,
    } else {
    }
    %c0 = arith.constant 0 : index
    %c0_1 = arith.constant 0 : index
    %3 = vector.load %arg2[%c0, %c0_1] : memref<8x32xf32, #tpu.memory_space<vmem>>, vector<8x32xf32>
    %4 = arith.truncf %3 : vector<8x32xf32> to vector<8x32xbf16>
    %c0_2 = arith.constant 0 : index
    %c0_3 = arith.constant 0 : index
    %5 = vector.load %arg3[%c0_2, %c0_3] : memref<32x128xbf16, #tpu.memory_space<vmem>>, vector<32x128xbf16>
    %cst = arith.constant dense<0.000000e+00> : vector<8x128xf32>
    %6 = tpu.matmul %4, %5, %cst {dimension_numbers = #tpu.dot_dimension_numbers<[1], [0], [0], [1], [0, 0, 1, 1], [], []>} : vector<8x32xbf16>, vector<32x128xbf16>, vector<8x128xf32> -> vector<8x128xf32>
    %c0_4 = arith.constant 0 : index
    %c0_5 = arith.constant 0 : index
    %7 = vector.load %arg4[%c0_4, %c0_5] : memref<1x128xf32, #tpu.memory_space<vmem>>, vector<1x128xf32>
    %8 = vector.broadcast %7 : vector<1x128xf32> to vector<8x128xf32>
    %9 = arith.addf %6, %8 : vector<8x128xf32>
    %cst_6 = arith.constant 0.000000e+00 : f32
    %10 = vector.broadcast %cst_6 : f32 to vector<8x128xf32>
    %11 = arith.maximumf %9, %10 : vector<8x128xf32>
    %c0_7 = arith.constant 0 : index
    %c0_8 = arith.constant 0 : index
    %12 = vector.load %arg8[%c0_7, %c0_8] : memref<8x128xf32, #tpu.memory_space<vmem>>, vector<8x128xf32>
    %13 = arith.truncf %11 : vector<8x128xf32> to vector<8x128xbf16>
    %c0_9 = arith.constant 0 : index
    %c0_10 = arith.constant 0 : index
    %14 = vector.load %arg5[%c0_9, %c0_10] : memref<128x128xbf16, #tpu.memory_space<vmem>>, vector<128x128xbf16>
    %cst_11 = arith.constant dense<0.000000e+00> : vector<8x128xf32>
    %15 = tpu.matmul %13, %14, %cst_11 {dimension_numbers = #tpu.dot_dimension_numbers<[1], [0], [0], [1], [0, 0, 1, 1], [], []>} : vector<8x128xbf16>, vector<128x128xbf16>, vector<8x128xf32> -> vector<8x128xf32>
    %16 = arith.addf %12, %15 : vector<8x128xf32>
    %c0_12 = arith.constant 0 : index
    %c0_13 = arith.constant 0 : index
    %17 = vector.load %arg8[%c0_12, %c0_13] : memref<8x128xf32, #tpu.memory_space<vmem>>, vector<8x128xf32>
    tpu.vector_store %arg8[%c0_12, %c0_13], %16 {strides = array<i32>} : memref<8x128xf32, #tpu.memory_space<vmem>>, vector<8x128xf32>,
    %c0_i32_14 = arith.constant 0 : i32
    %18 = arith.cmpi eq, %arg1, %c0_i32_14 : i32
    %19 = arith.extui %18 : i1 to i32
    %c0_i32_15 = arith.constant 0 : i32
    %20 = arith.cmpi ne, %19, %c0_i32_15 : i32
    scf.if %20 {
      %c0_16 = arith.constant 0 : index
      %c0_17 = arith.constant 0 : index
      %21 = vector.load %arg8[%c0_16, %c0_17] : memref<8x128xf32, #tpu.memory_space<vmem>>, vector<8x128xf32>
      %c0_18 = arith.constant 0 : index
      %c0_19 = arith.constant 0 : index
      %22 = vector.load %arg6[%c0_18, %c0_19] : memref<1x128xf32, #tpu.memory_space<vmem>>, vector<1x128xf32>
      %23 = vector.broadcast %22 : vector<1x128xf32> to vector<8x128xf32>
      %24 = arith.addf %21, %23 : vector<8x128xf32>
      %c0_20 = arith.constant 0 : index
      %c0_21 = arith.constant 0 : index
      %25 = vector.load %arg7[%c0_20, %c0_21] : memref<8x128xf32, #tpu.memory_space<vmem>>, vector<8x128xf32>
      tpu.vector_store %arg7[%c0_20, %c0_21], %24 {strides = array<i32>} : memref<8x128xf32, #tpu.memory_space<vmem>>, vector<8x128xf32>,
    } else {
    }
    return
  }
  func.func @transform_0(%arg0: i32, %arg1: i32) -> (i32, i32) {
    %c0_i32 = arith.constant 0 : i32
    %c0_i32_0 = arith.constant 0 : i32
    return %arg0, %c0_i32 : i32, i32
  }
  func.func @transform_1(%arg0: i32, %arg1: i32) -> (i32, i32) {
    %c0_i32 = arith.constant 0 : i32
    %c0_i32_0 = arith.constant 0 : i32
    return %c0_i32, %arg1 : i32, i32
  }
  func.func @transform_2(%arg0: i32, %arg1: i32) -> (i32, i32) {
    %c0_i32 = arith.constant 0 : i32
    %c0_i32_0 = arith.constant 0 : i32
    return %c0_i32, %arg1 : i32, i32
  }
  func.func @transform_3(%arg0: i32, %arg1: i32) -> (i32, i32) {
    %c0_i32 = arith.constant 0 : i32
    %c0_i32_0 = arith.constant 0 : i32
    return %arg1, %c0_i32 : i32, i32
  }
  func.func @transform_4(%arg0: i32, %arg1: i32) -> (i32, i32) {
    %c0_i32 = arith.constant 0 : i32
    %c0_i32_0 = arith.constant 0 : i32
    %c0_i32_1 = arith.constant 0 : i32
    return %c0_i32, %c0_i32_0 : i32, i32
  }
  func.func @transform_5(%arg0: i32, %arg1: i32) -> (i32, i32) {
    %c0_i32 = arith.constant 0 : i32
    %c0_i32_0 = arith.constant 0 : i32
    return %arg0, %c0_i32 : i32, i32
  }
}

</mosaic_0001>

<bundles_post_ra>
// kernel: tpu_custom_call.1
= control target key start
LH: loop header
LB: loop body
LE: loop exit
PB: predicated region body
PF: predicated region fallthrough
CT: control target
= control target key end

     0   :  { %10 = vsyncpa [#allocation4], 0  ;;  %s536_s0 = inlined_call_operand.hbm [shape: f32[8,32], index: 0, kind: input, shape index: {}]   ;;  %s537_s1 = inlined_call_operand.hbm [shape: bf16[32,128], index: 1, kind: input, shape index: {}]   ;;  %s538_s2 = inlined_call_operand.vmem [shape: f32[1,128], index: 2, kind: input, shape index: {}]   ;;  %s539_s3 = inlined_call_operand.hbm [shape: bf16[128,128], index: 3, kind: input, shape index: {}]   ;;  %s540_s4 = inlined_call_operand.vmem [shape: f32[1,128], index: 4, kind: input, shape index: {}]   ;;  %s541_s5 = inlined_call_operand.hbm [shape: f32[8,128], index: 5, kind: output, shape index: {}]  }
   0x1   :  { %11 = vsyncpa [#allocation7], 0 }
   0x2   :  { %12 = vsyncpa [#allocation5], 0  ;;  %s438_s18 = smov [#allocation6]   ;;  %s344_s22 = scalar_lea.hbm %s537_s1, 256 }
   0x3   :  { %s28_s19 = sshll.u32 %s438_s18, 4  ;;  %p345_p0 = scmp.ne.s32.totalorder %s537_s1, %s344_s22  ;;  %s29_s19 = int_to_ptr.vmem [resolvable:$true] %s28_s19 }
   0x4   :  { %p348_p1 = scmp.lt.u32.totalorder %s344_s22, %s537_s1 }
   0x6   :  { %p350_p2 = pnand %p348_p1, %p345_p0 }
   0x8   :  { %353 = shalt.err (!%p350_p2)
}
   0x9   :  { %s354_s27 = scalar_lea.vmem %s29_s19, 256  ;;  %p359_p4 = scmp.lt.s32.totalorder %s29_s19, %s29_s19 }
   0xa   :  { %p355_p3 = scmp.ne.s32.totalorder %s29_s19, %s354_s27  ;;  %p360_p5 = scmp.lt.s32.totalorder %s354_s27, %s354_s27 }
   0xc   :  { %p361_p6 = por %p360_p5, %p359_p4 }
   0xe   :  { %p362_p7 = pnand %p361_p6, %p355_p3 }
  0x10   :  { %365 = shalt.err (!%p362_p7)
}
  0x11   :  { %s439_s28 = smov 64   ;;  %s440_s29 = smov 4  }
  0x12   :  { %34 = dma.hbm_to_vmem [thread:$0]  %s537_s1, 256, %s29_s19, [#allocation7], %s439_s28, %s439_s28, %s440_s29  }
  0x13   :  { %s441_s7 = smov [#allocation3]   ;;  %s442_s9 = smov [#allocation8]  }
  0x14   :  { %s19_s8 = sshll.u32 %s441_s7, 4  ;;  %s42_s10 = sshll.u32 %s442_s9, 4  ;;  %s20_s8 = int_to_ptr.vmem [resolvable:$true] %s19_s8  ;;  %s43_s10 = int_to_ptr.vmem [resolvable:$true] %s42_s10 }
  0x15   :  { %s366_s13 = scalar_lea.hbm %s536_s0, 128 }
  0x16   :  { %p367_p8 = scmp.ne.s32.totalorder %s536_s0, %s366_s13  ;;  %p370_p9 = scmp.lt.u32.totalorder %s366_s13, %s536_s0 }
  0x18   :  { %p372_p10 = pnand %p370_p9, %p367_p8 }
  0x1a   :  { %375 = shalt.err (!%p372_p10)
}
  0x1b   :  { %s376_s1 = scalar_lea.vmem %s20_s8, 128  ;;  %p381_p12 = scmp.lt.s32.totalorder %s20_s8, %s20_s8 }
  0x1c   :  { %p377_p11 = scmp.ne.s32.totalorder %s20_s8, %s376_s1  ;;  %p382_p13 = scmp.lt.s32.totalorder %s376_s1, %s376_s1 }
  0x1e   :  { %p383_p0 = por %p382_p13, %p381_p12 }
  0x20   :  { %p384_p1 = pnand %p383_p0, %p377_p11 }
  0x22   :  { %387 = shalt.err (!%p384_p1)
}
  0x23   :  { %22 = dma.hbm_to_vmem [thread:$0]  %s536_s0, 128, %s20_s8, [#allocation4]  }
  0x24   :  { %s388_s22 = scalar_lea.hbm %s539_s3, 1024 }
  0x25   :  { %p389_p2 = scmp.ne.s32.totalorder %s539_s3, %s388_s22  ;;  %p392_p3 = scmp.lt.u32.totalorder %s388_s22, %s539_s3 }
  0x27   :  { %p394_p4 = pnand %p392_p3, %p389_p2 }
  0x29   :  { %397 = shalt.err (!%p394_p4)
}
  0x2a   :  { %s398_s27 = scalar_lea.vmem %s43_s10, 1024  ;;  %p403_p6 = scmp.lt.s32.totalorder %s43_s10, %s43_s10 }
  0x2b   :  { %p399_p5 = scmp.ne.s32.totalorder %s43_s10, %s398_s27  ;;  %p404_p7 = scmp.lt.s32.totalorder %s398_s27, %s398_s27 }
  0x2d   :  { %p405_p8 = por %p404_p7, %p403_p6 }
  0x2f   :  { %p406_p9 = pnand %p405_p8, %p399_p5 }
  0x31   :  { %409 = shalt.err (!%p406_p9)
}
  0x32   :  { %48 = dma.hbm_to_vmem [thread:$0]  %s539_s3, 1024, %s43_s10, [#allocation7], %s439_s28, %s439_s28, %s440_s29  }
  0x33   :  { %432 = dma.done.wait [#allocation4], 128  }
  0x34   :  { %433 = vsyncadd [#allocation4], 4294967168 }
  0x35   :  { %434 = dma.done.wait [#allocation7], 1280  }
  0x36   :  { %435 = vsyncadd [#allocation7], 4294966016  ;;  %v443_v0 = vmov 0.0   ;;  %vm444_vm0 = vmmov 0   ;;  %v334_v1 = vld [vmem:[#allocation6] sm:$0xff]   ;;  %v335_v2 = vld [vmem:[#allocation6 + $0x8] sm:$0xff]  }
  0x37   :  { %298 = vmatprep.subr.bf16.mxu0 %v443_v0  ;;  %302 = vmatprep.mubr.msk.bf16.mxu0 %vm444_vm0, %v443_v0  ;;  %v66_v3 = vld [vmem:[#allocation3] sm:$0xff]  ;;  %v336_v4 = vld [vmem:[#allocation8] sm:$0xff]   ;;  %vm91_vm1 = vcmask 261120   ;;  %v338_v7 = vld [vmem:[#allocation8 + $0x10] sm:$0xff]   ;;  %s445_s7 = smov [#allocation9]  }
  0x38   :  { %306 = vmatprep.subr.bf16.mxu1 %v443_v0  ;;  %322 = vmatprep.mubr.msk.bf16.mxu1 %vm444_vm0, %v443_v0  ;;  %v67_v5 = vpack.c.bf16 %v66_v3, %v66_v3  ;;  %v337_v6 = vld [vmem:[#allocation8 + $0x8] sm:$0xff]   ;;  %v339_v8 = vld [vmem:[#allocation8 + $0x18] sm:$0xff]   ;;  %v340_v9 = vld [vmem:[#allocation8 + $0x20] sm:$0xff]   ;;  %s263_s8 = sshll.u32 %s445_s7, 4  ;;  %s264_s8 = int_to_ptr.vmem [resolvable:$true] %s263_s8 }
  0x39   :  { %299 = vmatpush3.bf16.msra.mxu0 %v334_v1  ;;  %307 = vmatpush3.bf16.msra.mxu1 %v336_v4  ;;  %v341_v10 = vld [vmem:[#allocation8 + $0x28] sm:$0xff]   ;;  %v342_v11 = vld [vmem:[#allocation8 + $0x30] sm:$0xff]   ;;  %v343_v12 = vld [vmem:[#allocation8 + $0x38] sm:$0xff]   ;;  %p415_p11 = scmp.lt.s32.totalorder %s264_s8, %s264_s8 }
  0x3a   :  { %300 = vmatprep.subr.bf16.mxu0 %v443_v0  ;;  %308 = vmatprep.subr.bf16.mxu1 %v443_v0  ;;  %v273_v13 = vld [vmem:[%s538_s2] ss:$0 sm:$0xff]  ;;  %s410_s2 = scalar_lea.vmem %s264_s8, 128 }
  0x3b   :  { %v285_v21 = vld [vmem:[%s540_s4] ss:$0 sm:$0xff]  ;;  %p411_p10 = scmp.ne.s32.totalorder %s264_s8, %s410_s2  ;;  %p416_p12 = scmp.lt.s32.totalorder %s410_s2, %s410_s2 }
  0x3d   :  { %301 = vmatpush3.bf16.msra.mxu0 %v335_v2  ;;  %309 = vmatpush3.bf16.msra.mxu1 %v337_v6  ;;  %p417_p13 = por %p416_p12, %p415_p11 }
  0x3e   :  { %310 = vmatprep.subr.bf16.mxu1 %v443_v0 }
  0x3f   :  { %p418_p0 = pnand %p417_p13, %p411_p10 }
  0x40   :  { %303 = vmatmul.mubr.msk.bf16.vlgmr.msra.gmra.mrb[0].mxu0 %vm91_vm1, %v67_v5 }
  0x41   :  { %311 = vmatpush3.bf16.msra.mxu1 %v338_v7 }
  0x42   :  { %312 = vmatprep.subr.bf16.mxu1 %v443_v0 }
  0x45   :  { %313 = vmatpush3.bf16.msra.mxu1 %v339_v8 }
  0x46   :  { %314 = vmatprep.subr.bf16.mxu1 %v443_v0 }
  0x49   :  { %315 = vmatpush3.bf16.msra.mxu1 %v340_v9 }
  0x4a   :  { %316 = vmatprep.subr.bf16.mxu1 %v443_v0 }
  0x4d   :  { %317 = vmatpush3.bf16.msra.mxu1 %v341_v10 }
  0x4e   :  { %318 = vmatprep.subr.bf16.mxu1 %v443_v0 }
  0x51   :  { %319 = vmatpush3.bf16.msra.mxu1 %v342_v11 }
  0x52   :  { %320 = vmatprep.subr.bf16.mxu1 %v443_v0 }
  0x55   :  { %321 = vmatpush3.bf16.msra.mxu1 %v343_v12 }
 0x113   :  { %v129_v14 = vpop.f32.mrb[0].mxu0 }
 0x114   :  { %v130_v15 = vadd.f32 %v273_v13, %v129_v14  ;;  %v304_v16 = vpop.f32.mrb[1].mxu0 }
 0x115   :  { %v132_v17 = vpop.f32.mrb[2].mxu0 }
 0x116   :  { %v135_v18 = vmax.f32 %v130_v15, 0.0  ;;  %v305_v19 = vpop.f32.mrb[3].mxu0 }
 0x118   :  { %v137_v20 = vpack.c.bf16 %v135_v18, %v135_v18 }
 0x11a   :  { %323 = vmatmul.mubr.bf16.vlgmr.msra.gmra.mrb[0].mxu1 %v137_v20 }
 0x1ed   :  { %v236_v22 = vpop.f32.mrb[0].mxu1 }
 0x1ee   :  { %v255_v23 = vadd.f32 %v285_v21, %v236_v22  ;;  %v324_v24 = vpop.f32.mrb[1].mxu1 }
 0x1ef   :  { %v239_v25 = vpop.f32.mrb[2].mxu1 }
 0x1f0   :  { %256 = vst [vmem:[#allocation9] sm:$0xff] %v255_v23  ;;  %v325_v26 = vpop.f32.mrb[3].mxu1 }
 0x1f1   :  { %421 = shalt.err (!%p418_p0)
}
 0x1f2   :  { %s422_s4 = scalar_lea.hbm %s541_s5, 128 }
 0x1f3   :  { %p423_p1 = scmp.ne.s32.totalorder %s541_s5, %s422_s4  ;;  %p426_p2 = scmp.lt.u32.totalorder %s422_s4, %s541_s5 }
 0x1f5   :  { %p428_p3 = pnand %p426_p2, %p423_p1 }
 0x1f7   :  { %431 = shalt.err (!%p428_p3)
}
 0x1f8   :  { %266 = dma.vmem_to_hbm [thread:$0]  %s264_s8, 128, %s541_s5, [#allocation5]  }
 0x1f9   :  { %436 = dma.done.wait [#allocation5], 128  }
 0x1fa   :  { %437 = vsyncadd [#allocation5], 4294967168 }
 0x1fb   :  { %270 = vsyncpa [#allocation4], 1 }
 0x1fc   :  { %271 = vsyncpa [#allocation7], 1 }
 0x1fd   :  { %272 = vsyncpa [#allocation5], 1 }

// kernel: tpu_custom_call.1
= control target key start
LH: loop header
LB: loop body
LE: loop exit
PB: predicated region body
PF: predicated region fallthrough
CT: control target
= control target key end

     0   :  { %10 = vsyncpa [#allocation4], 0  ;;  %s536_s0 = inlined_call_operand.hbm [shape: f32[8,32], index: 0, kind: input, shape index: {}]   ;;  %s537_s1 = inlined_call_operand.hbm [shape: bf16[32,128], index: 1, kind: input, shape index: {}]   ;;  %s538_s2 = inlined_call_operand.vmem [shape: f32[1,128], index: 2, kind: input, shape index: {}]   ;;  %s539_s3 = inlined_call_operand.hbm [shape: bf16[128,128], index: 3, kind: input, shape index: {}]   ;;  %s540_s4 = inlined_call_operand.vmem [shape: f32[1,128], index: 4, kind: input, shape index: {}]   ;;  %s541_s5 = inlined_call_operand.hbm [shape: f32[8,128], index: 5, kind: output, shape index: {}]  }
   0x1   :  { %11 = vsyncpa [#allocation7], 0 }
   0x2   :  { %12 = vsyncpa [#allocation5], 0  ;;  %s438_s18 = smov [#allocation6]   ;;  %s344_s22 = scalar_lea.hbm %s537_s1, 256 }
   0x3   :  { %s28_s19 = sshll.u32 %s438_s18, 4  ;;  %p345_p0 = scmp.ne.s32.totalorder %s537_s1, %s344_s22  ;;  %s29_s19 = int_to_ptr.vmem [resolvable:$true] %s28_s19 }
   0x4   :  { %p348_p1 = scmp.lt.u32.totalorder %s344_s22, %s537_s1 }
   0x6   :  { %p350_p2 = pnand %p348_p1, %p345_p0 }
   0x8   :  { %353 = shalt.err (!%p350_p2)
}
   0x9   :  { %s354_s27 = scalar_lea.vmem %s29_s19, 256  ;;  %p359_p4 = scmp.lt.s32.totalorder %s29_s19, %s29_s19 }
   0xa   :  { %p355_p3 = scmp.ne.s32.totalorder %s29_s19, %s354_s27  ;;  %p360_p5 = scmp.lt.s32.totalorder %s354_s27, %s354_s27 }
   0xc   :  { %p361_p6 = por %p360_p5, %p359_p4 }
   0xe   :  { %p362_p7 = pnand %p361_p6, %p355_p3 }
  0x10   :  { %365 = shalt.err (!%p362_p7)
}
  0x11   :  { %s439_s28 = smov 64   ;;  %s440_s29 = smov 4  }
  0x12   :  { %34 = dma.hbm_to_vmem [thread:$0]  %s537_s1, 256, %s29_s19, [#allocation7], %s439_s28, %s439_s28, %s440_s29  }
  0x13   :  { %s441_s7 = smov [#allocation3]   ;;  %s442_s9 = smov [#allocation8]  }
  0x14   :  { %s19_s8 = sshll.u32 %s441_s7, 4  ;;  %s42_s10 = sshll.u32 %s442_s9, 4  ;;  %s20_s8 = int_to_ptr.vmem [resolvable:$true] %s19_s8  ;;  %s43_s10 = int_to_ptr.vmem [resolvable:$true] %s42_s10 }
  0x15   :  { %s366_s13 = scalar_lea.hbm %s536_s0, 128 }
  0x16   :  { %p367_p8 = scmp.ne.s32.totalorder %s536_s0, %s366_s13  ;;  %p370_p9 = scmp.lt.u32.totalorder %s366_s13, %s536_s0 }
  0x18   :  { %p372_p10 = pnand %p370_p9, %p367_p8 }
  0x1a   :  { %375 = shalt.err (!%p372_p10)
}
  0x1b   :  { %s376_s1 = scalar_lea.vmem %s20_s8, 128  ;;  %p381_p12 = scmp.lt.s32.totalorder %s20_s8, %s20_s8 }
  0x1c   :  { %p377_p11 = scmp.ne.s32.totalorder %s20_s8, %s376_s1  ;;  %p382_p13 = scmp.lt.s32.totalorder %s376_s1, %s376_s1 }
  0x1e   :  { %p383_p0 = por %p382_p13, %p381_p12 }
  0x20   :  { %p384_p1 = pnand %p383_p0, %p377_p11 }
  0x22   :  { %387 = shalt.err (!%p384_p1)
}
  0x23   :  { %22 = dma.hbm_to_vmem [thread:$0]  %s536_s0, 128, %s20_s8, [#allocation4]  }
  0x24   :  { %s388_s22 = scalar_lea.hbm %s539_s3, 1024 }
  0x25   :  { %p389_p2 = scmp.ne.s32.totalorder %s539_s3, %s388_s22  ;;  %p392_p3 = scmp.lt.u32.totalorder %s388_s22, %s539_s3 }
  0x27   :  { %p394_p4 = pnand %p392_p3, %p389_p2 }
  0x29   :  { %397 = shalt.err (!%p394_p4)
}
  0x2a   :  { %s398_s27 = scalar_lea.vmem %s43_s10, 1024  ;;  %p403_p6 = scmp.lt.s32.totalorder %s43_s10, %s43_s10 }
  0x2b   :  { %p399_p5 = scmp.ne.s32.totalorder %s43_s10, %s398_s27  ;;  %p404_p7 = scmp.lt.s32.totalorder %s398_s27, %s398_s27 }
  0x2d   :  { %p405_p8 = por %p404_p7, %p403_p6 }
  0x2f   :  { %p406_p9 = pnand %p405_p8, %p399_p5 }
  0x31   :  { %409 = shalt.err (!%p406_p9)
}
  0x32   :  { %48 = dma.hbm_to_vmem [thread:$0]  %s539_s3, 1024, %s43_s10, [#allocation7], %s439_s28, %s439_s28, %s440_s29  }
  0x33   :  { %432 = dma.done.wait [#allocation4], 128  }
  0x34   :  { %433 = vsyncadd [#allocation4], 4294967168 }
  0x35   :  { %434 = dma.done.wait [#allocation7], 1280  }
  0x36   :  { %435 = vsyncadd [#allocation7], 4294966016  ;;  %v443_v0 = vmov 0.0   ;;  %vm444_vm0 = vmmov 0   ;;  %v334_v1 = vld [vmem:[#allocation6] sm:$0xff]   ;;  %v335_v2 = vld [vmem:[#allocation6 + $0x8] sm:$0xff]  }
  0x37   :  { %298 = vmatprep.subr.bf16.mxu0 %v443_v0  ;;  %302 = vmatprep.mubr.msk.bf16.mxu0 %vm444_vm0, %v443_v0  ;;  %v66_v3 = vld [vmem:[#allocation3] sm:$0xff]  ;;  %v336_v4 = vld [vmem:[#allocation8] sm:$0xff]   ;;  %vm91_vm1 = vcmask 261120   ;;  %v338_v7 = vld [vmem:[#allocation8 + $0x10] sm:$0xff]   ;;  %s445_s7 = smov [#allocation9]  }
  0x38   :  { %306 = vmatprep.subr.bf16.mxu1 %v443_v0  ;;  %322 = vmatprep.mubr.msk.bf16.mxu1 %vm444_vm0, %v443_v0  ;;  %v67_v5 = vpack.c.bf16 %v66_v3, %v66_v3  ;;  %v337_v6 = vld [vmem:[#allocation8 + $0x8] sm:$0xff]   ;;  %v339_v8 = vld [vmem:[#allocation8 + $0x18] sm:$0xff]   ;;  %v340_v9 = vld [vmem:[#allocation8 + $0x20] sm:$0xff]   ;;  %s263_s8 = sshll.u32 %s445_s7, 4  ;;  %s264_s8 = int_to_ptr.vmem [resolvable:$true] %s263_s8 }
  0x39   :  { %299 = vmatpush3.bf16.msra.mxu0 %v334_v1  ;;  %307 = vmatpush3.bf16.msra.mxu1 %v336_v4  ;;  %v341_v10 = vld [vmem:[#allocation8 + $0x28] sm:$0xff]   ;;  %v342_v11 = vld [vmem:[#allocation8 + $0x30] sm:$0xff]   ;;  %v343_v12 = vld [vmem:[#allocation8 + $0x38] sm:$0xff]   ;;  %p415_p11 = scmp.lt.s32.totalorder %s264_s8, %s264_s8 }
  0x3a   :  { %300 = vmatprep.subr.bf16.mxu0 %v443_v0  ;;  %308 = vmatprep.subr.bf16.mxu1 %v443_v0  ;;  %v273_v13 = vld [vmem:[%s538_s2] ss:$0 sm:$0xff]  ;;  %s410_s2 = scalar_lea.vmem %s264_s8, 128 }
  0x3b   :  { %v285_v21 = vld [vmem:[%s540_s4] ss:$0 sm:$0xff]  ;;  %p411_p10 = scmp.ne.s32.totalorder %s264_s8, %s410_s2  ;;  %p416_p12 = scmp.lt.s32.totalorder %s410_s2, %s410_s2 }
  0x3d   :  { %301 = vmatpush3.bf16.msra.mxu0 %v335_v2  ;;  %309 = vmatpush3.bf16.msra.mxu1 %v337_v6  ;;  %p417_p13 = por %p416_p12, %p415_p11 }
  0x3e   :  { %310 = vmatprep.subr.bf16.mxu1 %v443_v0 }
  0x3f   :  { %p418_p0 = pnand %p417_p13, %p411_p10 }
  0x40   :  { %303 = vmatmul.mubr.msk.bf16.vlgmr.msra.gmra.mrb[0].mxu0 %vm91_vm1, %v67_v5 }
  0x41   :  { %311 = vmatpush3.bf16.msra.mxu1 %v338_v7 }
  0x42   :  { %312 = vmatprep.subr.bf16.mxu1 %v443_v0 }
  0x45   :  { %313 = vmatpush3.bf16.msra.mxu1 %v339_v8 }
  0x46   :  { %314 = vmatprep.subr.bf16.mxu1 %v443_v0 }
  0x49   :  { %315 = vmatpush3.bf16.msra.mxu1 %v340_v9 }
  0x4a   :  { %316 = vmatprep.subr.bf16.mxu1 %v443_v0 }
  0x4d   :  { %317 = vmatpush3.bf16.msra.mxu1 %v341_v10 }
  0x4e   :  { %318 = vmatprep.subr.bf16.mxu1 %v443_v0 }
  0x51   :  { %319 = vmatpush3.bf16.msra.mxu1 %v342_v11 }
  0x52   :  { %320 = vmatprep.subr.bf16.mxu1 %v443_v0 }
  0x55   :  { %321 = vmatpush3.bf16.msra.mxu1 %v343_v12 }
 0x113   :  { %v129_v14 = vpop.f32.mrb[0].mxu0 }
 0x114   :  { %v130_v15 = vadd.f32 %v273_v13, %v129_v14  ;;  %v304_v16 = vpop.f32.mrb[1].mxu0 }
 0x115   :  { %v132_v17 = vpop.f32.mrb[2].mxu0 }
 0x116   :  { %v135_v18 = vmax.f32 %v130_v15, 0.0  ;;  %v305_v19 = vpop.f32.mrb[3].mxu0 }
 0x118   :  { %v137_v20 = vpack.c.bf16 %v135_v18, %v135_v18 }
 0x11a   :  { %323 = vmatmul.mubr.bf16.vlgmr.msra.gmra.mrb[0].mxu1 %v137_v20 }
 0x1ed   :  { %v236_v22 = vpop.f32.mrb[0].mxu1 }
 0x1ee   :  { %v255_v23 = vadd.f32 %v285_v21, %v236_v22  ;;  %v324_v24 = vpop.f32.mrb[1].mxu1 }
 0x1ef   :  { %v239_v25 = vpop.f32.mrb[2].mxu1 }
 0x1f0   :  { %256 = vst [vmem:[#allocation9] sm:$0xff] %v255_v23  ;;  %v325_v26 = vpop.f32.mrb[3].mxu1 }
 0x1f1   :  { %421 = shalt.err (!%p418_p0)
}
 0x1f2   :  { %s422_s4 = scalar_lea.hbm %s541_s5, 128 }
 0x1f3   :  { %p423_p1 = scmp.ne.s32.totalorder %s541_s5, %s422_s4  ;;  %p426_p2 = scmp.lt.u32.totalorder %s422_s4, %s541_s5 }
 0x1f5   :  { %p428_p3 = pnand %p426_p2, %p423_p1 }
 0x1f7   :  { %431 = shalt.err (!%p428_p3)
}
 0x1f8   :  { %266 = dma.vmem_to_hbm [thread:$0]  %s264_s8, 128, %s541_s5, [#allocation5]  }
 0x1f9   :  { %436 = dma.done.wait [#allocation5], 128  }
 0x1fa   :  { %437 = vsyncadd [#allocation5], 4294967168 }
 0x1fb   :  { %270 = vsyncpa [#allocation4], 1 }
 0x1fc   :  { %271 = vsyncpa [#allocation7], 1 }
 0x1fd   :  { %272 = vsyncpa [#allocation5], 1 }

</bundles_post_ra>
